<compile_context>
chip_gen: v7x
topology: tpu7x:2x2x1
jax: 0.10.0
libtpu: 0.0.40
codegen_flags: <defaults>
</compile_context>

<pallas_src>
import functools
import random

import jax
import jax.numpy as jnp
from jax import lax
from jax.experimental import pallas as pl
from jax.experimental.pallas import tpu as pltpu

PAD = 128  # lane width: every feature axis is zero-padded into one 128-lane vreg


# ---------------------------------------------------------------------------
# Fused rollout kernel: grid=(), all T steps in one kernel invocation.
# ---------------------------------------------------------------------------
def _rollout_kernel(gx_ref, ge_ref, h0x_ref, h0e_ref, oh_ref, lap_ref,
                    w1ea_ref, w1eb_ref, b1e_ref, w2e_ref, b2e_ref,
                    w1n_ref, b1n_ref, w2n_ref, b2n_ref,
                    outn_ref, oute_ref,
                    *, T, E, dnx, x_band, t_band, s_band, coeff, pde, skip, a, b):
    f32 = jnp.float32
    bf = lambda v: v.astype(jnp.bfloat16)
    N = h0x_ref.shape[0]

    # lane masks for the packed node output (new_x | tder | sder bands) — built once
    lanes = lax.broadcasted_iota(jnp.int32, (1, PAD), 1)
    band_mask = lambda off: ((lanes >= off) & (lanes < off + dnx)).astype(f32)
    m_x, m_t, m_s = band_mask(x_band), band_mask(t_band), band_mask(s_band)

    def step(t, carry):
        hx_prev, hx, he = carry                       # f32 (N,PAD), (N,PAD), (E,PAD)

        # "graph_concat" by disjoint lane placement: concat == add
        x_cat = gx_ref[t] + hx                        # g.x @ [0,fx), h.x @ [fx,fxc) (+replicas)
        e_cat = ge_ref[t] + he                        # g.e / h.e @ [fxc, fxc+fec)
        x_cat_bf = bf(x_cat)

        # --- fused endpoint gather: one (2E,N) one-hot MXU matmul, split rows at E ---
        oh = oh_ref[...]                              # (2E, N) bf16  [senders ; receivers]
        xsd = jnp.dot(oh, x_cat_bf, preferred_element_type=f32)     # (2E, PAD)
        x_src = xsd[:E]
        x_dst = xsd[E:]

        # --- edge MLP: W1 collapsed to 2 matmuls via lane packing [x_src | e_cat] ---
        h1e = (jnp.dot(bf(x_src + e_cat), w1ea_ref[...], preferred_element_type=f32)
               + jnp.dot(bf(x_dst), w1eb_ref[...], preferred_element_type=f32)
               + b1e_ref[...])
        h1e = jnp.maximum(h1e, 0.0)                                  # f32 epilogue
        new_e = jnp.dot(bf(h1e), w2e_ref[...], preferred_element_type=f32) + b2e_ref[...]

        # --- scatter-add onto receivers: recv_oh^T @ new_e (no materialized transpose) ---
        agg = lax.dot_general(oh[E:], bf(new_e), (((0,), (0,)), ((), ())),
                              preferred_element_type=f32)            # (N, PAD)

        # --- node MLP: W1 collapsed to 1 matmul via lane packing [x_cat | agg] ---
        h1n = jnp.dot(bf(x_cat + agg), w1n_ref[...], preferred_element_type=f32) + b1n_ref[...]
        h1n = jnp.maximum(h1n, 0.0)
        new_x = jnp.dot(bf(h1n), w2n_ref[...], preferred_element_type=f32) + b2n_ref[...]

        if skip:
            new_x = new_x + hx
            new_e = new_e + he

        # --- fused epilogue: time derivative (+ t==0 "h_prev is None" fallback) ---
        diff0 = new_x - hx
        if pde == 'wave':
            other = new_x - 2.0 * hx + hx_prev
        elif pde == 'random':
            other = new_x + a * hx + b * hx_prev
        elif pde == 'both':
            other = 2.0 * new_x - 3.0 * hx + hx_prev
        else:                                          # 'diff' and default
            other = diff0
        first = (t == 0).astype(f32)
        tder = first * diff0 + (1.0 - first) * other

        # spatial derivative on the PRE-update hidden state (matches laplacian.mm(h_curr.x))
        sder = (-coeff) * jnp.dot(lap_ref[...], bf(hx), preferred_element_type=f32)

        # packed, lane-dense node output: new_x / tder / sder in three disjoint bands.
        # (new_x, hx, hx_prev carry identical replicas at all three bands, so tder/sder
        #  already hold the right values in their bands; the masks just select.)
        outn_ref[t] = new_x * m_x + tder * m_t + sder * m_s
        oute_ref[t] = new_e
        return (hx, new_x, new_e)

    lax.fori_loop(0, T, step,
                  (jnp.zeros((N, PAD), f32), h0x_ref[...], h0e_ref[...]))


# ---------------------------------------------------------------------------
# Parameter / padding helpers
# ---------------------------------------------------------------------------
def _linear_init(key, din, dout):
    """nn.Linear-style deterministic init: U(-1/sqrt(din), 1/sqrt(din))."""
    kw, kb = jax.random.split(key)
    s = 1.0 / jnp.sqrt(jnp.float32(din))
    w = jax.random.uniform(kw, (din, dout), jnp.float32, -s, s)
    b = jax.random.uniform(kb, (1, dout), jnp.float32, -s, s)
    return w, b


def _pad_tile(w, row_off=0, col_off=0, out=None):
    if out is None:
        out = jnp.zeros((PAD, PAD), jnp.float32)
    return out.at[row_off:row_off + w.shape[0],
                  col_off:col_off + w.shape[1]].set(w.astype(jnp.float32))


def _row128(vec, col_off=0):
    out = jnp.zeros((1, PAD), jnp.float32)
    v = vec.reshape(1, -1).astype(jnp.float32)
    return out.at[:, col_off:col_off + v.shape[1]].set(v)


def _pad_rows(a, col_offsets):
    """Place a (rows, F) array into (rows, PAD) at one or more lane offsets."""
    out = jnp.zeros((a.shape[0], PAD), jnp.float32)
    for off in col_offsets:
        out = out.at[:, off:off + a.shape[1]].set(a.astype(jnp.float32))
    return out


# ---------------------------------------------------------------------------
# PhysicsInformedGNConv (forward pass only)
# ---------------------------------------------------------------------------
class PhysicsInformedGNConvPallas:
    def __init__(self, key, fx, fe, dnx, dne, hidden):
        random.seed(0)                        # deterministic a, b (used only for pde='random')
        self.a = 5 * random.random() - 2.5
        self.b = 5 * random.random() - 2.5
        self.fx, self.fe, self.dnx, self.dne, self.hidden = fx, fe, dnx, dne, hidden
        fxc, fec = fx + dnx, fe + dne
        self.fxc, self.fec = fxc, fec
        # lane layout (all bands disjoint inside one 128-lane vreg):
        #   [0, fx)                 g.x
        #   [fx, fxc)               h.x / new_x             (x output band)
        #   [fxc, fxc+fe)           g.edge_attr
        #   [fxc+fe, fxc+fec)       h.edge_attr / new_e     (edge output band)
        #   [fxc+fec, +dnx)         h.x replica -> time-derivative band
        #   [fxc+fec+dnx, +dnx)     h.x replica -> spatial-derivative band
        self.e_band = fxc + fe
        self.t_band = fxc + fec
        self.s_band = fxc + fec + dnx
        assert self.s_band + dnx <= PAD and hidden <= PAD

        ks = jax.random.split(key, 4)
        edge_in = fec + 2 * fxc
        node_in = fxc + dne
        we1, be1 = _linear_init(ks[0], edge_in, hidden)
        we2, be2 = _linear_init(ks[1], hidden, dne)
        wn1, bn1 = _linear_init(ks[2], node_in, hidden)
        wn2, bn2 = _linear_init(ks[3], hidden, dnx)

        bf16 = jnp.bfloat16
        # edge W1 "a": operand lanes = [x_src @ [0,fxc) | e_cat @ [fxc,fxc+fec)]
        w1ea = _pad_tile(we1[fec:fec + fxc], 0, 0)          # x_src rows
        w1ea = _pad_tile(we1[:fec], fxc, 0, w1ea)           # e_cat rows
        self.w1e_a = w1ea.astype(bf16)
        # edge W1 "b": operand = x_dst alone (lanes [0, fxc))
        self.w1e_b = _pad_tile(we1[fec + fxc:], 0, 0).astype(bf16)
        self.b1e = _row128(be1)                             # f32 epilogue biases
        self.w2e = _pad_tile(we2, 0, self.e_band).astype(bf16)   # new_e -> edge band
        self.b2e = _row128(be2, self.e_band)
        # node W1: operand lanes = [x_cat @ [0,fxc) | agg @ [e_band, e_band+dne)]
        w1n = _pad_tile(wn1[:fxc], 0, 0)
        w1n = _pad_tile(wn1[fxc:], self.e_band, 0, w1n)
        self.w1n = w1n.astype(bf16)
        self.b1n = _row128(bn1)
        # node W2 / bias replicated into the x, tder and sder bands (enables packed output)
        w2n = jnp.zeros((PAD, PAD), jnp.float32)
        b2n = jnp.zeros((1, PAD), jnp.float32)
        for off in (fx, self.t_band, self.s_band):
            w2n = _pad_tile(wn2, 0, off, w2n)
            b2n = b2n.at[:, off:off + dnx].set(bn2.astype(jnp.float32))
        self.w2n = w2n.astype(bf16)
        self.b2n = b2n

    def __call__(self, input_graphs, edge_index, laplacian, h_init,
                 coeff=0.1, pde='diff', skip=False, training=True):
        senders, receivers = edge_index
        n = int(laplacian.shape[0])
        e = int(senders.shape[0])
        T = len(input_graphs)
        fx, fe, dnx, dne, fxc = self.fx, self.fe, self.dnx, self.dne, self.fxc
        e_band, t_band, s_band = self.e_band, self.t_band, self.s_band

        # XLA glue: lane-pad inputs, build the stacked (2E, N) one-hot gather matrix
        # (0/1 values are exact in bf16). hidden-state init is replicated into the
        # tder / sder bands so the packed output needs no lane shifts.
        gx = jnp.stack([_pad_rows(g['x'], (0,)) for g in input_graphs])           # (T,N,PAD)
        ge = jnp.stack([_pad_rows(g['edge_attr'], (fxc,)) for g in input_graphs])  # (T,E,PAD)
        h0x = _pad_rows(h_init['x'], (fx, t_band, s_band))                         # (N,PAD)
        h0e = _pad_rows(h_init['edge_attr'], (e_band,))                            # (E,PAD)
        stacked_oh = jnp.concatenate(
            [jax.nn.one_hot(senders, n, dtype=jnp.bfloat16),
             jax.nn.one_hot(receivers, n, dtype=jnp.bfloat16)], axis=0)            # (2E, N)
        lap_bf = laplacian.astype(jnp.bfloat16)                                    # (N, N)

        kernel = functools.partial(
            _rollout_kernel, T=T, E=e, dnx=dnx,
            x_band=fx, t_band=t_band, s_band=s_band,
            coeff=float(coeff), pde=pde, skip=bool(skip),
            a=float(self.a), b=float(self.b))

        # grid=(): whole-array VMEM-resident operands, single kernel launch for the
        # whole rollout.  TODO(synk): re-tile (grid over rows/time) once
        # T*(N+E)*PAD*4B or the O(N*E) one-hots stop fitting the VMEM budget below.
        outn, oute = pl.pallas_call(
            kernel,
            out_shape=(jax.ShapeDtypeStruct((T, n, PAD), jnp.float32),   # packed x|tder|sder
                       jax.ShapeDtypeStruct((T, e, PAD), jnp.float32)),  # edge_attr
            compiler_params=pltpu.CompilerParams(
                vmem_limit_bytes=64 * 1024 * 1024),
        )(gx, ge, h0x, h0e, stacked_oh, lap_bf,
          self.w1e_a, self.w1e_b, self.b1e, self.w2e, self.b2e,
          self.w1n, self.b1n, self.w2n, self.b2n)

        out_x = outn[:, :, fx:fx + dnx]
        tder = outn[:, :, t_band:t_band + dnx]
        sder = outn[:, :, s_band:s_band + dnx]
        out_e = oute[:, :, e_band:e_band + dne]

        output_tensors = [{'x': out_x[t], 'edge_attr': out_e[t]} for t in range(T)]
        # derivatives are only returned in training mode (matches reference self.training)
        time_derivatives = [tder[t] for t in range(T)] if training else []
        spatial_derivatives = [sder[t] for t in range(T)] if training else []
        return output_tensors, time_derivatives, spatial_derivatives


# ---------------------------------------------------------------------------
# Main
# ---------------------------------------------------------------------------
if __name__ == "__main__":
    key = jax.random.PRNGKey(0)
    N, E, T = 16, 32, 4          # nodes, edges (ring graph, 2 per node), time steps
    FX = FE = 8                  # input node / edge feature dims
    DNX = DNE = 8                # hidden-state node / edge feature dims
    HID = 32                     # MLP hidden width

    # ring graph: each node -> next and prev
    idx = jnp.arange(N, dtype=jnp.int32)
    senders = jnp.concatenate([idx, idx])
    receivers = jnp.concatenate([(idx + 1) % N, (idx - 1) % N]).astype(jnp.int32)
    edge_index = (senders, receivers)

    # graph Laplacian L = D - A (dense, [N, N])
    adj = jnp.zeros((N, N), jnp.float32).at[senders, receivers].add(1.0)
    laplacian = jnp.diag(adj.sum(axis=1)) - adj

    ks = jax.random.split(key, 2 * T + 3)
    input_graphs = [
        {'x': jax.random.normal(ks[2 * t], (N, FX), jnp.float32),
         'edge_attr': jax.random.normal(ks[2 * t + 1], (E, FE), jnp.float32)}
        for t in range(T)
    ]
    h_init = {'x': jax.random.normal(ks[-3], (N, DNX), jnp.float32),
              'edge_attr': jax.random.normal(ks[-2], (E, DNE), jnp.float32)}

    model = PhysicsInformedGNConvPallas(ks[-1], FX, FE, DNX, DNE, HID)
    outputs, time_derivs, spatial_derivs = model(
        input_graphs, edge_index, laplacian, h_init,
        coeff=0.1, pde='diff', skip=False, training=True)

    for leaf in jax.tree_util.tree_leaves((outputs, time_derivs, spatial_derivs)):
        jax.block_until_ready(leaf)
    assert len(outputs) == T and len(time_derivs) == T and len(spatial_derivs) == T
    assert outputs[0]['x'].shape == (N, DNX)
    assert outputs[0]['edge_attr'].shape == (E, DNE)
    assert time_derivs[0].shape == (N, DNX)
    assert spatial_derivs[0].shape == (N, DNX)
    assert all(bool(jnp.all(jnp.isfinite(outputs[t]['x']))) for t in range(T))
    assert all(bool(jnp.all(jnp.isfinite(time_derivs[t]))) for t in range(T))
    assert all(bool(jnp.all(jnp.isfinite(spatial_derivs[t]))) for t in range(T))
    print("KERNEL_OK")
</pallas_src>

<mosaic_0001>
module attributes {stable_mosaic.version = 11 : i64} {
  func.func @_rollout_kernel(%arg0: memref<4x16x128xf32, #tpu.memory_space<vmem>>, %arg1: memref<4x32x128xf32, #tpu.memory_space<vmem>>, %arg2: memref<16x128xf32, #tpu.memory_space<vmem>>, %arg3: memref<32x128xf32, #tpu.memory_space<vmem>>, %arg4: memref<64x16xbf16, #tpu.memory_space<vmem>>, %arg5: memref<16x16xbf16, #tpu.memory_space<vmem>>, %arg6: memref<128x128xbf16, #tpu.memory_space<vmem>>, %arg7: memref<128x128xbf16, #tpu.memory_space<vmem>>, %arg8: memref<1x128xf32, #tpu.memory_space<vmem>>, %arg9: memref<128x128xbf16, #tpu.memory_space<vmem>>, %arg10: memref<1x128xf32, #tpu.memory_space<vmem>>, %arg11: memref<128x128xbf16, #tpu.memory_space<vmem>>, %arg12: memref<1x128xf32, #tpu.memory_space<vmem>>, %arg13: memref<128x128xbf16, #tpu.memory_space<vmem>>, %arg14: memref<1x128xf32, #tpu.memory_space<vmem>>, %arg15: memref<4x16x128xf32, #tpu.memory_space<vmem>>, %arg16: memref<4x32x128xf32, #tpu.memory_space<vmem>>) attributes {dimension_semantics = [], scalar_prefetch = 0 : i64, scratch_operands = 0 : i64, tpu.core_type = #tpu.core_type<tc>} {
    %0 = tpu.iota {dimensions = array<i32: 1>} : vector<1x128xi32>
    %c8_i32 = arith.constant 8 : i32
    %1 = vector.broadcast %c8_i32 : i32 to vector<1x128xi32>
    %2 = arith.cmpi sge, %0, %1 : vector<1x128xi32>
    %c16_i32 = arith.constant 16 : i32
    %3 = vector.broadcast %c16_i32 : i32 to vector<1x128xi32>
    %4 = arith.cmpi slt, %0, %3 : vector<1x128xi32>
    %5 = arith.andi %2, %4 : vector<1x128xi1>
    %6 = arith.extui %5 : vector<1x128xi1> to vector<1x128xi32>
    %7 = arith.sitofp %6 : vector<1x128xi32> to vector<1x128xf32>
    %c32_i32 = arith.constant 32 : i32
    %8 = vector.broadcast %c32_i32 : i32 to vector<1x128xi32>
    %9 = arith.cmpi sge, %0, %8 : vector<1x128xi32>
    %c40_i32 = arith.constant 40 : i32
    %10 = vector.broadcast %c40_i32 : i32 to vector<1x128xi32>
    %11 = arith.cmpi slt, %0, %10 : vector<1x128xi32>
    %12 = arith.andi %9, %11 : vector<1x128xi1>
    %13 = arith.extui %12 : vector<1x128xi1> to vector<1x128xi32>
    %14 = arith.sitofp %13 : vector<1x128xi32> to vector<1x128xf32>
    %c40_i32_0 = arith.constant 40 : i32
    %15 = vector.broadcast %c40_i32_0 : i32 to vector<1x128xi32>
    %16 = arith.cmpi sge, %0, %15 : vector<1x128xi32>
    %c48_i32 = arith.constant 48 : i32
    %17 = vector.broadcast %c48_i32 : i32 to vector<1x128xi32>
    %18 = arith.cmpi slt, %0, %17 : vector<1x128xi32>
    %19 = arith.andi %16, %18 : vector<1x128xi1>
    %20 = arith.extui %19 : vector<1x128xi1> to vector<1x128xi32>
    %21 = arith.sitofp %20 : vector<1x128xi32> to vector<1x128xf32>
    %c0 = arith.constant 0 : index
    %c0_1 = arith.constant 0 : index
    %22 = vector.load %arg2[%c0, %c0_1] : memref<16x128xf32, #tpu.memory_space<vmem>>, vector<16x128xf32>
    %c0_2 = arith.constant 0 : index
    %c0_3 = arith.constant 0 : index
    %23 = vector.load %arg3[%c0_2, %c0_3] : memref<32x128xf32, #tpu.memory_space<vmem>>, vector<32x128xf32>
    %c0_i32 = arith.constant 0 : i32
    %c4_i32 = arith.constant 4 : i32
    %24 = arith.addi %c0_i32, %c4_i32 : i32
    %c1_i32 = arith.constant 1 : i32
    %25:2 = scf.for %arg17 = %c0_i32 to %24 step %c1_i32 iter_args(%arg18 = %22, %arg19 = %23) -> (vector<16x128xf32>, vector<32x128xf32>)  : i32 {
      %26 = arith.index_cast %arg17 : i32 to index
      %c0_5 = arith.constant 0 : index
      %c0_6 = arith.constant 0 : index
      %27 = vector.load %arg0[%26, %c0_5, %c0_6] : memref<4x16x128xf32, #tpu.memory_space<vmem>>, vector<1x16x128xf32>
      %28 = vector.shape_cast %27 : vector<1x16x128xf32> to vector<16x128xf32>
      %29 = arith.addf %28, %arg18 : vector<16x128xf32>
      %30 = arith.index_cast %arg17 : i32 to index
      %c0_7 = arith.constant 0 : index
      %c0_8 = arith.constant 0 : index
      %31 = vector.load %arg1[%30, %c0_7, %c0_8] : memref<4x32x128xf32, #tpu.memory_space<vmem>>, vector<1x32x128xf32>
      %32 = vector.shape_cast %31 : vector<1x32x128xf32> to vector<32x128xf32>
      %33 = arith.addf %32, %arg19 : vector<32x128xf32>
      %34 = arith.truncf %29 : vector<16x128xf32> to vector<16x128xbf16>
      %c0_9 = arith.constant 0 : index
      %c0_10 = arith.constant 0 : index
      %35 = vector.load %arg4[%c0_9, %c0_10] : memref<64x16xbf16, #tpu.memory_space<vmem>>, vector<64x16xbf16>
      %cst = arith.constant dense<0.000000e+00> : vector<64x128xf32>
      %36 = tpu.matmul %35, %34, %cst {dimension_numbers = #tpu.dot_dimension_numbers<[1], [0], [0], [1], [0, 0, 1, 1], [], []>} : vector<64x16xbf16>, vector<16x128xbf16>, vector<64x128xf32> -> vector<64x128xf32>
      %37 = vector.extract_strided_slice %36 {offsets = [0, 0], sizes = [32, 128], strides = [1, 1]} : vector<64x128xf32> to vector<32x128xf32>
      %38 = vector.extract_strided_slice %36 {offsets = [32, 0], sizes = [32, 128], strides = [1, 1]} : vector<64x128xf32> to vector<32x128xf32>
      %39 = arith.addf %37, %33 : vector<32x128xf32>
      %40 = arith.truncf %39 : vector<32x128xf32> to vector<32x128xbf16>
      %c0_11 = arith.constant 0 : index
      %c0_12 = arith.constant 0 : index
      %41 = vector.load %arg6[%c0_11, %c0_12] : memref<128x128xbf16, #tpu.memory_space<vmem>>, vector<128x128xbf16>
      %cst_13 = arith.constant dense<0.000000e+00> : vector<32x128xf32>
      %42 = tpu.matmul %40, %41, %cst_13 {dimension_numbers = #tpu.dot_dimension_numbers<[1], [0], [0], [1], [0, 0, 1, 1], [], []>} : vector<32x128xbf16>, vector<128x128xbf16>, vector<32x128xf32> -> vector<32x128xf32>
      %43 = arith.truncf %38 : vector<32x128xf32> to vector<32x128xbf16>
      %c0_14 = arith.constant 0 : index
      %c0_15 = arith.constant 0 : index
      %44 = vector.load %arg7[%c0_14, %c0_15] : memref<128x128xbf16, #tpu.memory_space<vmem>>, vector<128x128xbf16>
      %cst_16 = arith.constant dense<0.000000e+00> : vector<32x128xf32>
      %45 = tpu.matmul %43, %44, %cst_16 {dimension_numbers = #tpu.dot_dimension_numbers<[1], [0], [0], [1], [0, 0, 1, 1], [], []>} : vector<32x128xbf16>, vector<128x128xbf16>, vector<32x128xf32> -> vector<32x128xf32>
      %46 = arith.addf %42, %45 : vector<32x128xf32>
      %c0_17 = arith.constant 0 : index
      %c0_18 = arith.constant 0 : index
      %47 = vector.load %arg8[%c0_17, %c0_18] : memref<1x128xf32, #tpu.memory_space<vmem>>, vector<1x128xf32>
      %48 = vector.broadcast %47 : vector<1x128xf32> to vector<32x128xf32>
      %49 = arith.addf %46, %48 : vector<32x128xf32>
      %cst_19 = arith.constant 0.000000e+00 : f32
      %50 = vector.broadcast %cst_19 : f32 to vector<32x128xf32>
      %51 = arith.maximumf %49, %50 : vector<32x128xf32>
      %52 = arith.truncf %51 : vector<32x128xf32> to vector<32x128xbf16>
      %c0_20 = arith.constant 0 : index
      %c0_21 = arith.constant 0 : index
      %53 = vector.load %arg9[%c0_20, %c0_21] : memref<128x128xbf16, #tpu.memory_space<vmem>>, vector<128x128xbf16>
      %cst_22 = arith.constant dense<0.000000e+00> : vector<32x128xf32>
      %54 = tpu.matmul %52, %53, %cst_22 {dimension_numbers = #tpu.dot_dimension_numbers<[1], [0], [0], [1], [0, 0, 1, 1], [], []>} : vector<32x128xbf16>, vector<128x128xbf16>, vector<32x128xf32> -> vector<32x128xf32>
      %c0_23 = arith.constant 0 : index
      %c0_24 = arith.constant 0 : index
      %55 = vector.load %arg10[%c0_23, %c0_24] : memref<1x128xf32, #tpu.memory_space<vmem>>, vector<1x128xf32>
      %56 = vector.broadcast %55 : vector<1x128xf32> to vector<32x128xf32>
      %57 = arith.addf %54, %56 : vector<32x128xf32>
      %58 = vector.extract_strided_slice %35 {offsets = [32, 0], sizes = [32, 16], strides = [1, 1]} : vector<64x16xbf16> to vector<32x16xbf16>
      %59 = arith.truncf %57 : vector<32x128xf32> to vector<32x128xbf16>
      %cst_25 = arith.constant dense<0.000000e+00> : vector<16x128xf32>
      %60 = tpu.matmul %58, %59, %cst_25 {dimension_numbers = #tpu.dot_dimension_numbers<[0], [0], [1], [1], [0, 1, 1, 1], [], []>} : vector<32x16xbf16>, vector<32x128xbf16>, vector<16x128xf32> -> vector<16x128xf32>
      %61 = arith.addf %29, %60 : vector<16x128xf32>
      %62 = arith.truncf %61 : vector<16x128xf32> to vector<16x128xbf16>
      %c0_26 = arith.constant 0 : index
      %c0_27 = arith.constant 0 : index
      %63 = vector.load %arg11[%c0_26, %c0_27] : memref<128x128xbf16, #tpu.memory_space<vmem>>, vector<128x128xbf16>
      %cst_28 = arith.constant dense<0.000000e+00> : vector<16x128xf32>
      %64 = tpu.matmul %62, %63, %cst_28 {dimension_numbers = #tpu.dot_dimension_numbers<[1], [0], [0], [1], [0, 0, 1, 1], [], []>} : vector<16x128xbf16>, vector<128x128xbf16>, vector<16x128xf32> -> vector<16x128xf32>
      %c0_29 = arith.constant 0 : index
      %c0_30 = arith.constant 0 : index
      %65 = vector.load %arg12[%c0_29, %c0_30] : memref<1x128xf32, #tpu.memory_space<vmem>>, vector<1x128xf32>
      %66 = vector.broadcast %65 : vector<1x128xf32> to vector<16x128xf32>
      %67 = arith.addf %64, %66 : vector<16x128xf32>
      %cst_31 = arith.constant 0.000000e+00 : f32
      %68 = vector.broadcast %cst_31 : f32 to vector<16x128xf32>
      %69 = arith.maximumf %67, %68 : vector<16x128xf32>
      %70 = arith.truncf %69 : vector<16x128xf32> to vector<16x128xbf16>
      %c0_32 = arith.constant 0 : index
      %c0_33 = arith.constant 0 : index
      %71 = vector.load %arg13[%c0_32, %c0_33] : memref<128x128xbf16, #tpu.memory_space<vmem>>, vector<128x128xbf16>
      %cst_34 = arith.constant dense<0.000000e+00> : vector<16x128xf32>
      %72 = tpu.matmul %70, %71, %cst_34 {dimension_numbers = #tpu.dot_dimension_numbers<[1], [0], [0], [1], [0, 0, 1, 1], [], []>} : vector<16x128xbf16>, vector<128x128xbf16>, vector<16x128xf32> -> vector<16x128xf32>
      %c0_35 = arith.constant 0 : index
      %c0_36 = arith.constant 0 : index
      %73 = vector.load %arg14[%c0_35, %c0_36] : memref<1x128xf32, #tpu.memory_space<vmem>>, vector<1x128xf32>
      %74 = vector.broadcast %73 : vector<1x128xf32> to vector<16x128xf32>
      %75 = arith.addf %72, %74 : vector<16x128xf32>
      %76 = arith.subf %75, %arg18 : vector<16x128xf32>
      %c0_i32_37 = arith.constant 0 : i32
      %77 = arith.cmpi eq, %arg17, %c0_i32_37 : i32
      %78 = arith.extui %77 : i1 to i32
      %79 = arith.sitofp %78 : i32 to f32
      %80 = vector.broadcast %79 : f32 to vector<16x128xf32>
      %81 = arith.mulf %80, %76 : vector<16x128xf32>
      %cst_38 = arith.constant 1.000000e+00 : f32
      %82 = arith.subf %cst_38, %79 : f32
      %83 = vector.broadcast %82 : f32 to vector<16x128xf32>
      %84 = arith.mulf %83, %76 : vector<16x128xf32>
      %85 = arith.addf %81, %84 : vector<16x128xf32>
      %c0_39 = arith.constant 0 : index
      %c0_40 = arith.constant 0 : index
      %86 = vector.load %arg5[%c0_39, %c0_40] : memref<16x16xbf16, #tpu.memory_space<vmem>>, vector<16x16xbf16>
      %87 = arith.truncf %arg18 : vector<16x128xf32> to vector<16x128xbf16>
      %cst_41 = arith.constant dense<0.000000e+00> : vector<16x128xf32>
      %88 = tpu.matmul %86, %87, %cst_41 {dimension_numbers = #tpu.dot_dimension_numbers<[1], [0], [0], [1], [0, 0, 1, 1], [], []>} : vector<16x16xbf16>, vector<16x128xbf16>, vector<16x128xf32> -> vector<16x128xf32>
      %cst_42 = arith.constant -1.000000e-01 : f32
      %89 = vector.broadcast %cst_42 : f32 to vector<16x128xf32>
      %90 = arith.mulf %89, %88 : vector<16x128xf32>
      %91 = vector.broadcast %7 : vector<1x128xf32> to vector<16x128xf32>
      %92 = arith.mulf %75, %91 : vector<16x128xf32>
      %93 = vector.broadcast %14 : vector<1x128xf32> to vector<16x128xf32>
      %94 = arith.mulf %85, %93 : vector<16x128xf32>
      %95 = arith.addf %92, %94 : vector<16x128xf32>
      %96 = vector.broadcast %21 : vector<1x128xf32> to vector<16x128xf32>
      %97 = arith.mulf %90, %96 : vector<16x128xf32>
      %98 = arith.addf %95, %97 : vector<16x128xf32>
      %99 = arith.index_cast %arg17 : i32 to index
      %c0_43 = arith.constant 0 : index
      %c0_44 = arith.constant 0 : index
      %100 = vector.load %arg15[%99, %c0_43, %c0_44] : memref<4x16x128xf32, #tpu.memory_space<vmem>>, vector<1x16x128xf32>
      %101 = vector.shape_cast %100 : vector<1x16x128xf32> to vector<16x128xf32>
      %102 = vector.shape_cast %98 : vector<16x128xf32> to vector<1x16x128xf32>
      tpu.vector_store %arg15[%99, %c0_43, %c0_44], %102 {strides = array<i32>} : memref<4x16x128xf32, #tpu.memory_space<vmem>>, vector<1x16x128xf32>,
      %103 = arith.index_cast %arg17 : i32 to index
      %c0_45 = arith.constant 0 : index
      %c0_46 = arith.constant 0 : index
      %104 = vector.load %arg16[%103, %c0_45, %c0_46] : memref<4x32x128xf32, #tpu.memory_space<vmem>>, vector<1x32x128xf32>
      %105 = vector.shape_cast %104 : vector<1x32x128xf32> to vector<32x128xf32>
      %106 = vector.shape_cast %57 : vector<32x128xf32> to vector<1x32x128xf32>
      tpu.vector_store %arg16[%103, %c0_45, %c0_46], %106 {strides = array<i32>} : memref<4x32x128xf32, #tpu.memory_space<vmem>>, vector<1x32x128xf32>,
      scf.yield %75, %57 : vector<16x128xf32>, vector<32x128xf32>
    }
    %c4_i32_4 = arith.constant 4 : i32
    return
  }
}

</mosaic_0001>

<bundles_post_ra>
// kernel: tpu_custom_call.1
= control target key start
LH: loop header
LB: loop body
LE: loop exit
PB: predicated region body
PF: predicated region fallthrough
CT: control target
= control target key end

     0   :  { %s2590_s0 = inlined_call_operand.hbm [shape: f32[4,16,128], index: 0, kind: input, shape index: {}]   ;;  %s2591_s1 = inlined_call_operand.hbm [shape: f32[4,32,128], index: 1, kind: input, shape index: {}]   ;;  %s2592_s2 = inlined_call_operand.hbm [shape: f32[16,128], index: 2, kind: input, shape index: {}]   ;;  %s2593_s3 = inlined_call_operand.hbm [shape: f32[32,128], index: 3, kind: input, shape index: {}]   ;;  %s2594_s4 = inlined_call_operand.hbm [shape: bf16[64,16], index: 4, kind: input, shape index: {}]   ;;  %s2595_s5 = inlined_call_operand.hbm [shape: bf16[16,16], index: 5, kind: input, shape index: {}]   ;;  %s2596_s6 = inlined_call_operand.hbm [shape: bf16[128,128], index: 6, kind: input, shape index: {}]   ;;  %s2597_s7 = inlined_call_operand.hbm [shape: bf16[128,128], index: 7, kind: input, shape index: {}]   ;;  %s2598_s8 = inlined_call_operand.hbm [shape: f32[1,128], index: 8, kind: input, shape index: {}]   ;;  %s2599_s9 = inlined_call_operand.hbm [shape: bf16[128,128], index: 9, kind: input, shape index: {}]   ;;  %s2600_s10 = inlined_call_operand.hbm [shape: f32[1,128], index: 10, kind: input, shape index: {}]   ;;  %s2601_s11 = inlined_call_operand.hbm [shape: bf16[128,128], index: 11, kind: input, shape index: {}]   ;;  %s2602_s12 = inlined_call_operand.hbm [shape: f32[1,128], index: 12, kind: input, shape index: {}]   ;;  %s2603_s13 = inlined_call_operand.hbm [shape: bf16[128,128], index: 13, kind: input, shape index: {}]   ;;  %s2604_s14 = inlined_call_operand.hbm [shape: f32[1,128], index: 14, kind: input, shape index: {}]   ;;  %s2605_s15 = inlined_call_operand.hbm [shape: f32[4,16,128], index: 15, kind: output, shape index: {0}]   ;;  %s2606_s16 = inlined_call_operand.hbm [shape: f32[4,32,128], index: 16, kind: output, shape index: {1}]  }
   0x1   :  { %2608 = sst [smem:[#allocation39_spill]] %s2590_s0 }
   0x2   :  { %22 = vsyncpa [#allocation3], 0 }
   0x3   :  { %23 = vsyncpa [#allocation6], 0 }
   0x4   :  { %24 = vsyncpa [#allocation9], 0 }
   0x5   :  { %25 = vsyncpa [#allocation12], 0 }
   0x6   :  { %26 = vsyncpa [#allocation15], 0 }
   0x7   :  { %27 = vsyncpa [#allocation18], 0 }
   0x8   :  { %28 = vsyncpa [#allocation21], 0 }
   0x9   :  { %29 = vsyncpa [#allocation24], 0 }
   0xa   :  { %30 = vsyncpa [#allocation4], 0 }
   0xb   :  { %31 = vsyncpa [#allocation28], 0  ;;  %s2053_s21 = smov [#allocation5]   ;;  %s2054_s23 = smov [#allocation8]  }
   0xc   :  { %s49_s22 = sshll.u32 %s2053_s21, 4  ;;  %s73_s24 = sshll.u32 %s2054_s23, 4  ;;  %s50_s22 = int_to_ptr.vmem [resolvable:$true] %s49_s22  ;;  %s2162_s24 = int_to_ptr.vmem [resolvable:$true] %s73_s24 }
   0xd   :  { %s1603_s27 = scalar_lea.hbm %s2591_s1, 2048 }
   0xe   :  { %p1604_p0 = scmp.ne.s32.totalorder %s2591_s1, %s1603_s27  ;;  %p1607_p1 = scmp.lt.u32.totalorder %s1603_s27, %s2591_s1 }
  0x10   :  { %p1609_p2 = pnand %p1607_p1, %p1604_p0 }
  0x12   :  { %1612 = shalt.err (!%p1609_p2)
}
  0x13   :  { %s1613_s17 = scalar_lea.vmem %s50_s22, 2048  ;;  %p1618_p4 = scmp.lt.s32.totalorder %s50_s22, %s50_s22 }
  0x14   :  { %p1614_p3 = scmp.ne.s32.totalorder %s50_s22, %s1613_s17  ;;  %p1619_p5 = scmp.lt.s32.totalorder %s1613_s17, %s1613_s17 }
  0x16   :  { %p1620_p6 = por %p1619_p5, %p1618_p4 }
  0x18   :  { %p1621_p7 = pnand %p1620_p6, %p1614_p3 }
  0x1a   :  { %1624 = shalt.err (!%p1621_p7)
}
  0x1b   :  { %s2055_s18 = smov 128   ;;  %s2056_s19 = smov 8  }
  0x1c   :  { %55 = dma.hbm_to_vmem [thread:$0]  %s2591_s1, 2048, %s50_s22, [#allocation6], %s2055_s18, %s2055_s18, %s2056_s19  }
  0x1d   :  { %s1625_s26 = scalar_lea.hbm %s2593_s3, 512 }
  0x1e   :  { %p1626_p8 = scmp.ne.s32.totalorder %s2593_s3, %s1625_s26  ;;  %p1629_p9 = scmp.lt.u32.totalorder %s1625_s26, %s2593_s3 }
  0x20   :  { %p1631_p10 = pnand %p1629_p9, %p1626_p8 }
  0x22   :  { %1634 = shalt.err (!%p1631_p10)
}
  0x23   :  { %s1635_s0 = scalar_lea.vmem %s2162_s24, 512  ;;  %p1640_p12 = scmp.lt.s32.totalorder %s2162_s24, %s2162_s24 }
  0x24   :  { %p1636_p11 = scmp.ne.s32.totalorder %s2162_s24, %s1635_s0  ;;  %p1641_p13 = scmp.lt.s32.totalorder %s1635_s0, %s1635_s0 }
  0x26   :  { %p1642_p0 = por %p1641_p13, %p1640_p12 }
  0x28   :  { %p1643_p1 = pnand %p1642_p0, %p1636_p11 }
  0x2a   :  { %1646 = shalt.err (!%p1643_p1)
}
  0x2b   :  { %79 = dma.hbm_to_vmem [thread:$0]  %s2593_s3, 512, %s2162_s24, [#allocation9], %s2055_s18, %s2055_s18, %s2056_s19  }
  0x2c   :  { %s2057_s17 = smov [#allocation11]   ;;  %s2058_s21 = smov [#allocation14]  }
  0x2d   :  { %s97_s20 = sshll.u32 %s2057_s17, 4  ;;  %s121_s23 = sshll.u32 %s2058_s21, 4  ;;  %s98_s20 = int_to_ptr.vmem [resolvable:$true] %s97_s20  ;;  %s2199_s23 = int_to_ptr.vmem [resolvable:$true] %s121_s23 }
  0x2e   :  { %s1647_s27 = scalar_lea.hbm %s2595_s5, 128 }
  0x2f   :  { %p1648_p2 = scmp.ne.s32.totalorder %s2595_s5, %s1647_s27  ;;  %p1651_p3 = scmp.lt.u32.totalorder %s1647_s27, %s2595_s5 }
  0x31   :  { %p1653_p4 = pnand %p1651_p3, %p1648_p2 }
  0x33   :  { %1656 = shalt.err (!%p1653_p4)
}
  0x34   :  { %s1657_s3 = scalar_lea.vmem %s98_s20, 128  ;;  %p1662_p6 = scmp.lt.s32.totalorder %s98_s20, %s98_s20 }
  0x35   :  { %p1658_p5 = scmp.ne.s32.totalorder %s98_s20, %s1657_s3  ;;  %p1663_p7 = scmp.lt.s32.totalorder %s1657_s3, %s1657_s3 }
  0x37   :  { %p1664_p8 = por %p1663_p7, %p1662_p6 }
  0x39   :  { %p1665_p9 = pnand %p1664_p8, %p1658_p5 }
  0x3b   :  { %1668 = shalt.err (!%p1665_p9)
}
  0x3c   :  { %s2059_s24 = smov 64   ;;  %s2060_s1 = smov 4  }
  0x3d   :  { %103 = dma.hbm_to_vmem [thread:$0]  %s2595_s5, 128, %s98_s20, [#allocation12], %s2059_s24, %s2059_s24, %s2060_s1  }
  0x3e   :  { %s1669_s26 = scalar_lea.hbm %s2597_s7, 1024 }
  0x3f   :  { %p1670_p10 = scmp.ne.s32.totalorder %s2597_s7, %s1669_s26  ;;  %p1673_p11 = scmp.lt.u32.totalorder %s1669_s26, %s2597_s7 }
  0x41   :  { %p1675_p12 = pnand %p1673_p11, %p1670_p10 }
  0x43   :  { %1678 = shalt.err (!%p1675_p12)
}
  0x44   :  { %s1679_s0 = scalar_lea.vmem %s2199_s23, 1024  ;;  %p1684_p0 = scmp.lt.s32.totalorder %s2199_s23, %s2199_s23 }
  0x45   :  { %p1680_p13 = scmp.ne.s32.totalorder %s2199_s23, %s1679_s0  ;;  %p1685_p1 = scmp.lt.s32.totalorder %s1679_s0, %s1679_s0 }
  0x47   :  { %p1686_p2 = por %p1685_p1, %p1684_p0 }
  0x49   :  { %p1687_p3 = pnand %p1686_p2, %p1680_p13 }
  0x4b   :  { %1690 = shalt.err (!%p1687_p3)
}
  0x4c   :  { %127 = dma.hbm_to_vmem [thread:$0]  %s2597_s7, 1024, %s2199_s23, [#allocation15], %s2059_s24, %s2059_s24, %s2060_s1  }
  0x4d   :  { %s2061_s3 = smov [#allocation17]   ;;  %s2062_s17 = smov [#allocation20]  }
  0x4e   :  { %s143_s22 = sshll.u32 %s2061_s3, 4  ;;  %s165_s21 = sshll.u32 %s2062_s17, 4  ;;  %s144_s22 = int_to_ptr.vmem [resolvable:$true] %s143_s22  ;;  %s2236_s21 = int_to_ptr.vmem [resolvable:$true] %s165_s21 }
  0x4f   :  { %s1691_s27 = scalar_lea.hbm %s2599_s9, 1024 }
  0x50   :  { %p1692_p4 = scmp.ne.s32.totalorder %s2599_s9, %s1691_s27  ;;  %p1695_p5 = scmp.lt.u32.totalorder %s1691_s27, %s2599_s9 }
  0x52   :  { %p1697_p6 = pnand %p1695_p5, %p1692_p4 }
  0x54   :  { %1700 = shalt.err (!%p1697_p6)
}
  0x55   :  { %s1701_s7 = scalar_lea.vmem %s144_s22, 1024  ;;  %p1706_p8 = scmp.lt.s32.totalorder %s144_s22, %s144_s22 }
  0x56   :  { %p1702_p7 = scmp.ne.s32.totalorder %s144_s22, %s1701_s7  ;;  %p1707_p9 = scmp.lt.s32.totalorder %s1701_s7, %s1701_s7 }
  0x58   :  { %p1708_p10 = por %p1707_p9, %p1706_p8 }
  0x5a   :  { %p1709_p11 = pnand %p1708_p10, %p1702_p7 }
  0x5c   :  { %1712 = shalt.err (!%p1709_p11)
}
  0x5d   :  { %149 = dma.hbm_to_vmem [thread:$0]  %s2599_s9, 1024, %s144_s22, [#allocation18], %s2059_s24, %s2059_s24, %s2060_s1  }
  0x5e   :  { %s1713_s17 = scalar_lea.hbm %s2601_s11, 1024 }
  0x5f   :  { %p1714_p12 = scmp.ne.s32.totalorder %s2601_s11, %s1713_s17  ;;  %p1717_p13 = scmp.lt.u32.totalorder %s1713_s17, %s2601_s11 }
  0x61   :  { %p1719_p0 = pnand %p1717_p13, %p1714_p12 }
  0x63   :  { %1722 = shalt.err (!%p1719_p0)
}
  0x64   :  { %s1723_s29 = scalar_lea.vmem %s2236_s21, 1024  ;;  %p1728_p2 = scmp.lt.s32.totalorder %s2236_s21, %s2236_s21 }
  0x65   :  { %p1724_p1 = scmp.ne.s32.totalorder %s2236_s21, %s1723_s29  ;;  %p1729_p3 = scmp.lt.s32.totalorder %s1723_s29, %s1723_s29 }
  0x67   :  { %p1730_p4 = por %p1729_p3, %p1728_p2 }
  0x69   :  { %p1731_p5 = pnand %p1730_p4, %p1724_p1 }
  0x6b   :  { %1734 = shalt.err (!%p1731_p5)
}
  0x6c   :  { %171 = dma.hbm_to_vmem [thread:$0]  %s2601_s11, 1024, %s2236_s21, [#allocation21], %s2059_s24, %s2059_s24, %s2060_s1  }
  0x6d   :  { %s2063_s30 = smov [#allocation23]   ;;  %s2064_s7 = smov [#allocation2]  }
  0x6e   :  { %s187_s0 = sshll.u32 %s2063_s30, 4  ;;  %s37_s23 = sshll.u32 %s2064_s7, 4  ;;  %s188_s0 = int_to_ptr.vmem [resolvable:$true] %s187_s0  ;;  %s2273_s23 = int_to_ptr.vmem [resolvable:$true] %s37_s23 }
  0x6f   :  { %s1735_s3 = scalar_lea.hbm %s2603_s13, 1024 }
  0x70   :  { %p1736_p6 = scmp.ne.s32.totalorder %s2603_s13, %s1735_s3  ;;  %p1739_p7 = scmp.lt.u32.totalorder %s1735_s3, %s2603_s13 }
  0x72   :  { %p1741_p8 = pnand %p1739_p7, %p1736_p6 }
  0x74   :  { %1744 = shalt.err (!%p1741_p8)
}
  0x75   :  { %s1745_s11 = scalar_lea.vmem %s188_s0, 1024  ;;  %p1750_p10 = scmp.lt.s32.totalorder %s188_s0, %s188_s0 }
  0x76   :  { %p1746_p9 = scmp.ne.s32.totalorder %s188_s0, %s1745_s11  ;;  %p1751_p11 = scmp.lt.s32.totalorder %s1745_s11, %s1745_s11 }
  0x78   :  { %p1752_p12 = por %p1751_p11, %p1750_p10 }
  0x7a   :  { %p1753_p13 = pnand %p1752_p12, %p1746_p9 }
  0x7c   :  { %1756 = shalt.err (!%p1753_p13)
}
  0x7d   :  { %193 = dma.hbm_to_vmem [thread:$0]  %s2603_s13, 1024, %s188_s0, [#allocation24], %s2059_s24, %s2059_s24, %s2060_s1  }
  0x7e   :  { %s2609_s22 = sld [smem:[#allocation39_spill]] }
  0x84   :  { %s1757_s30 = scalar_lea.hbm %s2609_s22, 1024 }
  0x85   :  { %p1758_p0 = scmp.ne.s32.totalorder %s2609_s22, %s1757_s30  ;;  %p1761_p1 = scmp.lt.u32.totalorder %s1757_s30, %s2609_s22 }
  0x87   :  { %p1763_p2 = pnand %p1761_p1, %p1758_p0 }
  0x89   :  { %1766 = shalt.err (!%p1763_p2)
}
  0x8a   :  { %s1767_s17 = scalar_lea.vmem %s2273_s23, 1024  ;;  %p1772_p4 = scmp.lt.s32.totalorder %s2273_s23, %s2273_s23 }
  0x8b   :  { %p1768_p3 = scmp.ne.s32.totalorder %s2273_s23, %s1767_s17  ;;  %p1773_p5 = scmp.lt.s32.totalorder %s1767_s17, %s1767_s17 }
  0x8d   :  { %p1774_p6 = por %p1773_p5, %p1772_p4 }
  0x8f   :  { %p1775_p7 = pnand %p1774_p6, %p1768_p3 }
  0x91   :  { %1778 = shalt.err (!%p1775_p7)
}
  0x92   :  { %43 = dma.hbm_to_vmem [thread:$0]  %s2609_s22, 1024, %s2273_s23, [#allocation3], %s2055_s18, %s2055_s18, %s2056_s19  }
  0x93   :  { %s2065_s25 = smov [#allocation7]   ;;  %s2066_s27 = smov [#allocation10]  }
  0x94   :  { %s61_s26 = sshll.u32 %s2065_s25, 4  ;;  %s85_s11 = sshll.u32 %s2066_s27, 4  ;;  %s62_s26 = int_to_ptr.vmem [resolvable:$true] %s61_s26  ;;  %s2310_s11 = int_to_ptr.vmem [resolvable:$true] %s85_s11 }
  0x95   :  { %s1779_s29 = scalar_lea.hbm %s2592_s2, 256 }
  0x96   :  { %p1780_p8 = scmp.ne.s32.totalorder %s2592_s2, %s1779_s29  ;;  %p1783_p9 = scmp.lt.u32.totalorder %s1779_s29, %s2592_s2 }
  0x98   :  { %p1785_p10 = pnand %p1783_p9, %p1780_p8 }
  0x9a   :  { %1788 = shalt.err (!%p1785_p10)
}
  0x9b   :  { %s1789_s23 = scalar_lea.vmem %s62_s26, 256  ;;  %p1794_p12 = scmp.lt.s32.totalorder %s62_s26, %s62_s26 }
  0x9c   :  { %p1790_p11 = scmp.ne.s32.totalorder %s62_s26, %s1789_s23  ;;  %p1795_p13 = scmp.lt.s32.totalorder %s1789_s23, %s1789_s23 }
  0x9e   :  { %p1796_p0 = por %p1795_p13, %p1794_p12 }
  0xa0   :  { %p1797_p1 = pnand %p1796_p0, %p1790_p11 }
  0xa2   :  { %1800 = shalt.err (!%p1797_p1)
}
  0xa3   :  { %67 = dma.hbm_to_vmem [thread:$0]  %s2592_s2, 256, %s62_s26, [#allocation6], %s2055_s18, %s2055_s18, %s2056_s19  }
  0xa4   :  { %s1801_s13 = scalar_lea.hbm %s2594_s4, 512 }
  0xa5   :  { %p1802_p2 = scmp.ne.s32.totalorder %s2594_s4, %s1801_s13  ;;  %p1805_p3 = scmp.lt.u32.totalorder %s1801_s13, %s2594_s4 }
  0xa7   :  { %p1807_p4 = pnand %p1805_p3, %p1802_p2 }
  0xa9   :  { %1810 = shalt.err (!%p1807_p4)
}
  0xaa   :  { %s1811_s28 = scalar_lea.vmem %s2310_s11, 512  ;;  %p1816_p6 = scmp.lt.s32.totalorder %s2310_s11, %s2310_s11 }
  0xab   :  { %p1812_p5 = scmp.ne.s32.totalorder %s2310_s11, %s1811_s28  ;;  %p1817_p7 = scmp.lt.s32.totalorder %s1811_s28, %s1811_s28 }
  0xad   :  { %p1818_p8 = por %p1817_p7, %p1816_p6 }
  0xaf   :  { %p1819_p9 = pnand %p1818_p8, %p1812_p5 }
  0xb1   :  { %1822 = shalt.err (!%p1819_p9)
}
  0xb2   :  { %91 = dma.hbm_to_vmem [thread:$0]  %s2594_s4, 512, %s2310_s11, [#allocation9], %s2059_s24, %s2059_s24, %s2060_s1  }
  0xb3   :  { %s2067_s29 = smov [#allocation13]   ;;  %s2068_s30 = smov [#allocation16]  }
  0xb4   :  { %s109_s9 = sshll.u32 %s2067_s29, 4  ;;  %s134_s7 = sshll.u32 %s2068_s30, 4  ;;  %s110_s9 = int_to_ptr.vmem [resolvable:$true] %s109_s9  ;;  %s135_s7 = int_to_ptr.vmem [resolvable:$true] %s134_s7 }
  0xb5   :  { %s1823_s22 = scalar_lea.hbm %s2596_s6, 1024 }
  0xb6   :  { %p1824_p10 = scmp.ne.s32.totalorder %s2596_s6, %s1823_s22  ;;  %p1827_p11 = scmp.lt.u32.totalorder %s1823_s22, %s2596_s6 }
  0xb8   :  { %p1829_p12 = pnand %p1827_p11, %p1824_p10 }
  0xba   :  { %1832 = shalt.err (!%p1829_p12)
}
  0xbb   :  { %s1833_s4 = scalar_lea.vmem %s110_s9, 1024  ;;  %p1838_p0 = scmp.lt.s32.totalorder %s110_s9, %s110_s9 }
  0xbc   :  { %p1834_p13 = scmp.ne.s32.totalorder %s110_s9, %s1833_s4  ;;  %p1839_p1 = scmp.lt.s32.totalorder %s1833_s4, %s1833_s4 }
  0xbe   :  { %p1840_p2 = por %p1839_p1, %p1838_p0 }
  0xc0   :  { %p1841_p3 = pnand %p1840_p2, %p1834_p13 }
  0xc2   :  { %1844 = shalt.err (!%p1841_p3)
}
  0xc3   :  { %115 = dma.hbm_to_vmem [thread:$0]  %s2596_s6, 1024, %s110_s9, [#allocation12], %s2059_s24, %s2059_s24, %s2060_s1  }
  0xc4   :  { %s1845_s21 = scalar_lea.hbm %s2598_s8, 16 }
  0xc5   :  { %p1846_p4 = scmp.ne.s32.totalorder %s2598_s8, %s1845_s21  ;;  %p1849_p5 = scmp.lt.u32.totalorder %s1845_s21, %s2598_s8 }
  0xc7   :  { %p1851_p6 = pnand %p1849_p5, %p1846_p4 }
  0xc9   :  { %1854 = shalt.err (!%p1851_p6)
}
  0xca   :  { %s1855_s30 = scalar_lea.vmem %s135_s7, 16  ;;  %s1859_s5 = scalar_lea.vmem %s135_s7, 32 }
  0xcb   :  { %p1856_p7 = scmp.ne.s32.totalorder %s135_s7, %s1855_s30  ;;  %p1860_p8 = scmp.lt.s32.totalorder %s135_s7, %s135_s7 }
  0xcc   :  { %p1861_p9 = scmp.lt.s32.totalorder %s1859_s5, %s1855_s30 }
  0xce   :  { %p1862_p10 = por %p1861_p9, %p1860_p8 }
  0xd0   :  { %p1863_p11 = pnand %p1862_p10, %p1856_p7 }
  0xd2   :  { %1866 = shalt.err (!%p1863_p11)
}
  0xd3   :  { %137 = dma.hbm_to_vmem [thread:$0]  %s2598_s8, 16, %s135_s7, [#allocation15]  }
  0xd4   :  { %s2069_s1 = smov [#allocation19]   ;;  %s2070_s23 = smov [#allocation22]  }
  0xd5   :  { %s156_s9 = sshll.u32 %s2069_s1, 4  ;;  %s178_s22 = sshll.u32 %s2070_s23, 4  ;;  %s157_s9 = int_to_ptr.vmem [resolvable:$true] %s156_s9  ;;  %s179_s22 = int_to_ptr.vmem [resolvable:$true] %s178_s22 }
  0xd6   :  { %s1867_s17 = scalar_lea.hbm %s2600_s10, 16 }
  0xd7   :  { %p1868_p12 = scmp.ne.s32.totalorder %s2600_s10, %s1867_s17  ;;  %p1871_p13 = scmp.lt.u32.totalorder %s1867_s17, %s2600_s10 }
  0xd9   :  { %p1873_p0 = pnand %p1871_p13, %p1868_p12 }
  0xdb   :  { %1876 = shalt.err (!%p1873_p0)
}
  0xdc   :  { %s1877_s8 = scalar_lea.vmem %s157_s9, 16  ;;  %s1881_s7 = scalar_lea.vmem %s157_s9, 32 }
  0xdd   :  { %p1878_p1 = scmp.ne.s32.totalorder %s157_s9, %s1877_s8  ;;  %p1882_p2 = scmp.lt.s32.totalorder %s157_s9, %s157_s9 }
  0xde   :  { %p1883_p3 = scmp.lt.s32.totalorder %s1881_s7, %s1877_s8 }
  0xe0   :  { %p1884_p4 = por %p1883_p3, %p1882_p2 }
  0xe2   :  { %p1885_p5 = pnand %p1884_p4, %p1878_p1 }
  0xe4   :  { %1888 = shalt.err (!%p1885_p5)
}
  0xe5   :  { %159 = dma.hbm_to_vmem [thread:$0]  %s2600_s10, 16, %s157_s9, [#allocation18]  }
  0xe6   :  { %s1889_s2 = scalar_lea.hbm %s2602_s12, 16 }
  0xe7   :  { %p1890_p6 = scmp.ne.s32.totalorder %s2602_s12, %s1889_s2  ;;  %p1893_p7 = scmp.lt.u32.totalorder %s1889_s2, %s2602_s12 }
  0xe9   :  { %p1895_p8 = pnand %p1893_p7, %p1890_p6 }
  0xeb   :  { %1898 = shalt.err (!%p1895_p8)
}
  0xec   :  { %s1899_s6 = scalar_lea.vmem %s179_s22, 16  ;;  %s1903_s24 = scalar_lea.vmem %s179_s22, 32 }
  0xed   :  { %p1900_p9 = scmp.ne.s32.totalorder %s179_s22, %s1899_s6  ;;  %p1904_p10 = scmp.lt.s32.totalorder %s179_s22, %s179_s22 }
  0xee   :  { %p1905_p11 = scmp.lt.s32.totalorder %s1903_s24, %s1899_s6 }
  0xf0   :  { %p1906_p12 = por %p1905_p11, %p1904_p10 }
  0xf2   :  { %p1907_p13 = pnand %p1906_p12, %p1900_p9 }
  0xf4   :  { %1910 = shalt.err (!%p1907_p13)
}
  0xf5   :  { %181 = dma.hbm_to_vmem [thread:$0]  %s2602_s12, 16, %s179_s22, [#allocation21]  }
  0xf6   :  { %s2071_s9 = smov [#allocation25]   ;;  %s1911_s17 = scalar_lea.hbm %s2604_s14, 16 }
  0xf7   :  { %s200_s23 = sshll.u32 %s2071_s9, 4  ;;  %p1912_p0 = scmp.ne.s32.totalorder %s2604_s14, %s1911_s17  ;;  %s201_s23 = int_to_ptr.vmem [resolvable:$true] %s200_s23 }
  0xf8   :  { %p1915_p1 = scmp.lt.u32.totalorder %s1911_s17, %s2604_s14 }
  0xfa   :  { %p1917_p2 = pnand %p1915_p1, %p1912_p0 }
  0xfc   :  { %1920 = shalt.err (!%p1917_p2)
}
  0xfd   :  { %s1921_s8 = scalar_lea.vmem %s201_s23, 16  ;;  %s1925_s12 = scalar_lea.vmem %s201_s23, 32 }
  0xfe   :  { %p1922_p3 = scmp.ne.s32.totalorder %s201_s23, %s1921_s8  ;;  %p1926_p4 = scmp.lt.s32.totalorder %s201_s23, %s201_s23 }
  0xff   :  { %p1927_p5 = scmp.lt.s32.totalorder %s1925_s12, %s1921_s8 }
 0x101   :  { %p1928_p6 = por %p1927_p5, %p1926_p4 }
 0x103   :  { %p1929_p7 = pnand %p1928_p6, %p1922_p3 }
 0x105   :  { %1932 = shalt.err (!%p1929_p7)
}
 0x106   :  { %203 = dma.hbm_to_vmem [thread:$0]  %s2604_s14, 16, %s201_s23, [#allocation24]  }
 0x107   :  { %2005 = dma.done.wait [#allocation3], 1024  }
 0x108   :  { %2006 = vsyncadd [#allocation3], 4294966272 }
 0x109   :  { %2007 = dma.done.wait [#allocation6], 2304  }
 0x10a   :  { %2008 = vsyncadd [#allocation6], 4294964992 }
 0x10b   :  { %2009 = dma.done.wait [#allocation9], 1024  }
 0x10c   :  { %2010 = vsyncadd [#allocation9], 4294966272 }
 0x10d   :  { %2011 = dma.done.wait [#allocation12], 1152  }
 0x10e   :  { %2012 = vsyncadd [#allocation12], 4294966144 }
 0x10f   :  { %2013 = dma.done.wait [#allocation15], 1040  }
 0x110   :  { %2014 = vsyncadd [#allocation15], 4294966256 }
 0x111   :  { %2015 = dma.done.wait [#allocation18], 1040  }
 0x112   :  { %2016 = vsyncadd [#allocation18], 4294966256 }
 0x113   :  { %2017 = dma.done.wait [#allocation21], 1040  }
 0x114   :  { %2018 = vsyncadd [#allocation21], 4294966256 }
 0x115   :  { %2019 = dma.done.wait [#allocation24], 1040  }
 0x116   :  { %2020 = vsyncadd [#allocation24], 4294966256  ;;  %v250_v0 = vlaneseq  ;;  %v2072_v2 = vmov 0.0   ;;  %v267_v4 = vld [vmem:[#allocation7] sm:$0xff]   ;;  %v268_v5 = vld [vmem:[#allocation7 + $0x8] sm:$0xff]   ;;  %s2428_s14 = smov 0  }
 0x117   :  { %v269_v6 = vld [vmem:[#allocation8] sm:$0xff]   ;;  %v270_v8 = vld [vmem:[#allocation8 + $0x8] sm:$0xff]   ;;  %v271_v9 = vld [vmem:[#allocation8 + $0x10] sm:$0xff]  }
 0x118   :  { %v251_v1 = vand.u32 127, %v250_v0  ;;  %v272_v10 = vld [vmem:[#allocation8 + $0x18] sm:$0xff]  }
 0x11a   :  { %vm252_vm0 = vcmp.ge.s32.totalorder %v251_v1, 8  ;;  %vm253_vm1 = vcmp.lt.s32.totalorder %v251_v1, 16  ;;  %vm257_vm2 = vcmp.ge.s32.totalorder %v251_v1, 32  ;;  %vm258_vm3 = vcmp.lt.s32.totalorder %v251_v1, 40 }
 0x11b   :  { %vm254_vm4 = vmand %vm252_vm0, %vm253_vm1  ;;  %vm262_vm6 = vcmp.ge.s32.totalorder %v251_v1, 40  ;;  %vm263_vm7 = vcmp.lt.s32.totalorder %v251_v1, 48 }
 0x11c   :  { %v2410_v3 = vsel %vm254_vm4, 1.0, %v2072_v2  ;;  %vm259_vm5 = vmand %vm257_vm2, %vm258_vm3 }
 0x11d   :  { %v2412_v7 = vsel %vm259_vm5, 1.0, %v2072_v2  ;;  %vm264_vm8 = vmand %vm262_vm6, %vm263_vm7 }
 0x11e   :  { %v2414_v11 = vsel %vm264_vm8, 1.0, %v2072_v2 }
 0x11f LB: > { %v1558_v12 = vld [vmem:[#allocation10] sm:$0xff]   ;;  %vm330_vm9 = vcmask 130048   ;;  %s1234_s25 = sshll.u32 %s2051_s14, 4  ;;  %v1560_v13 = vld [vmem:[#allocation10 + $0x10] sm:$0xff]   ;;  %v1561_v16 = vld [vmem:[#allocation10 + $0x18] sm:$0xff]   ;;  %s1235_s21 = sshll.u32 %s2051_s14, 5  ;;  %s2051_s14 = sphi %s2428_s14, %s278_s14   ;;  %v2047_v4 = vphi %v267_v4, %v2611_v4   ;;  %v2043_v5 = vphi %v268_v5, %v2610_v5   ;;  %v2039_v9 = vphi %v271_v9, %v2479_v9   ;;  %v2035_v10 = vphi %v272_v10, %v2486_v10   ;;  %v2031_v6 = vphi %v269_v6, %v2481_v6   ;;  %v2027_v8 = vphi %v270_v8, %v2489_v8  }
 0x120   : > { %1351 = vmatprep.mubr.msk.bf16.mxu0 %vm330_vm9, %v1558_v12  ;;  %s286_s27 = scalar_lea.vmem [#allocation2], %s1234_s25  ;;  %783 = vxpose.xlu0.c.b16.start [1/2] (short) (narrow) %v1560_v13, 16  ;;  %v1562_v19 = vld [vmem:[#allocation14] sm:$0xff]   ;;  %v1563_v20 = vld [vmem:[#allocation14 + $0x8] sm:$0xff]   ;;  %v1564_v23 = vld [vmem:[#allocation14 + $0x10] sm:$0xff]   ;;  %s292_s28 = scalar_lea.vmem [#allocation5], %s1235_s21 }
 0x121   : > { %v287_v14 = vld [vmem:[%s286_s27] sm:$0xff]  ;;  %v288_v15 = vld [vmem:[%s286_s27 + $0x8] sm:$0xff]  ;;  %1359 = vmatprep.subr.bf16.mxu1 %v1562_v19  ;;  %v1559_v22 = vld [vmem:[#allocation10 + $0x8] sm:$0xff]   ;;  %vm2074_vm10 = vmmov 0   ;;  %s1155_s2 = scalar_lea.vmem [#allocation27], %s1235_s21  ;;  %vm799_vm11 = vcmask 261120  }
 0x122   : > { %v2456_v17 = vadd.f32 %v2047_v4, %v287_v14  ;;  %v2459_v18 = vadd.f32 %v2043_v5, %v288_v15  ;;  %1360 = vmatpush3.bf16.msra.mxu1 %v1562_v19  ;;  %v1565_v24 = vld [vmem:[#allocation14 + $0x18] sm:$0xff]   ;;  %v1566_v25 = vld [vmem:[#allocation14 + $0x20] sm:$0xff]   ;;  %v1567_v26 = vld [vmem:[#allocation14 + $0x28] sm:$0xff]   ;;  %p1076_p8 = scmp.eq.s32.totalorder %s2051_s14, 0  ;;  %s1152_s5 = scalar_lea.vmem [#allocation26], %s1234_s25 }
 0x123   : > { %1361 = vmatprep.subr.bf16.mxu1 %v1563_v20  ;;  %v1568_v27 = vld [vmem:[#allocation14 + $0x30] sm:$0xff]   ;;  %v1569_v28 = vld [vmem:[#allocation14 + $0x38] sm:$0xff]   ;;  %v1570_v29 = vld [vmem:[#allocation13] sm:$0xff]   ;;  %s278_s14 = sadd.s32 1, %s2051_s14  }
 0x124   : > { %v301_v21 = vpack.c.bf16 %v2459_v18, %v2456_v17  ;;  %784 = vxpose.xlu0.c.b16.end [2/2] (short) (narrow) %v1561_v16, 16  ;;  %v1578_v30 = vld [vmem:[#allocation17] sm:$0xff]   ;;  %v1579_v31 = vld [vmem:[#allocation17 + $0x8] sm:$0xff]   ;;  %v1580_v32 = vld [vmem:[#allocation17 + $0x10] sm:$0xff]   ;;  %s1077_s26 = scalar_select %p1076_p8, 1, 0 }
 0x125   : > { %v1581_v33 = vld [vmem:[#allocation17 + $0x18] sm:$0xff]   ;;  %v1582_v34 = vld [vmem:[#allocation17 + $0x20] sm:$0xff]   ;;  %v1583_v35 = vld [vmem:[#allocation17 + $0x28] sm:$0xff]   ;;  %p275_p9 = scmp.ge.s32.totalorder %s278_s14, 4  }
 0x126   : > { %1349 = vmatprep.subr.bf16.mxu0 %v301_v21  ;;  %1362 = vmatpush3.bf16.msra.mxu1 %v1563_v20  ;;  %v295_v36 = vld [vmem:[%s292_s28 + $0x10] sm:$0xff]  ;;  %v296_v37 = vld [vmem:[%s292_s28 + $0x18] sm:$0xff]  ;;  %v293_v38 = vld [vmem:[%s292_s28] sm:$0xff]  ;;  %s1078_s29 = scvt.s32.f32 %s1077_s26  ;;  %s2075_s6 = smov (%p275_p9), [#allocation26]  }
 0x127   : > { %1350 = vmatpush3.bf16.msra.mxu0 %v301_v21  ;;  %1363 = vmatprep.subr.bf16.mxu1 %v1564_v23  ;;  %v294_v39 = vld [vmem:[%s292_s28 + $0x8] sm:$0xff]  ;;  %v299_v40 = vadd.f32 %v2039_v9, %v295_v36  ;;  %v300_v41 = vadd.f32 %v2035_v10, %v296_v37  ;;  %v297_v43 = vadd.f32 %v2031_v6, %v293_v38  ;;  %v1571_v60 = vld [vmem:[#allocation13 + $0x8] sm:$0xff]   ;;  %v1573_v62 = vld [vmem:[#allocation13 + $0x18] sm:$0xff]   ;;  %s1165_s24 = sshll.u32 (%p275_p9), %s2075_s6, 4  ;;  %s2076_s10 = smov (%p275_p9), [#allocation27]   ;;  %s1166_s24 = int_to_ptr.vmem [resolvable:$true] %s1165_s24 }
 0x128   : > { %1399 = vmatprep.subr.bf16.mxu0 %v1578_v30  ;;  %v298_v44 = vadd.f32 %v2027_v8, %v294_v39  ;;  %v1572_v61 = vld [vmem:[#allocation13 + $0x10] sm:$0xff]   ;;  %v1574_v63 = vld [vmem:[#allocation13 + $0x20] sm:$0xff]   ;;  %v1575_v0 = vld [vmem:[#allocation13 + $0x28] sm:$0xff]   ;;  %s1082_s30 = ssub.f32 1.0, %s1078_s29  ;;  %s1177_s1 = sshll.u32 (%p275_p9), %s2076_s10, 4  ;;  %s2553_s1 = int_to_ptr.vmem [resolvable:$true] %s1177_s1 }
 0x129   : > { %v1576_v1 = vld [vmem:[#allocation13 + $0x30] sm:$0xff]   ;;  %v1577_v2 = vld [vmem:[#allocation13 + $0x38] sm:$0xff]   ;;  %v1260_v9 = vld [vmem:[#allocation16] ss:$0 sm:$0xff]  ;;  %s1933_s9 = scalar_lea.vmem (%p275_p9), %s1166_s24, 1024  ;;  %p1938_p11 = scmp.lt.s32.totalorder (%p275_p9), %s1166_s24, %s1166_s24 }
 0x12a   : > { %1352 = vmatmul.mubr.msk.bf16.vlgmr.msra.gmra.mrb[0].mxu0 %vm330_vm9, %v1559_v22  ;;  %1364 = vmatpush3.bf16.msra.mxu1 %v1564_v23  ;;  %v1584_v6 = vld [vmem:[#allocation17 + $0x30] sm:$0xff]   ;;  %v1585_v8 = vld [vmem:[#allocation17 + $0x38] sm:$0xff]   ;;  %v1586_v36 = vld [vmem:[#allocation20] sm:$0xff]   ;;  %p1934_p10 = scmp.ne.s32.totalorder (%p275_p9), %s1166_s24, %s1933_s9  ;;  %p1939_p12 = scmp.lt.s32.totalorder (%p275_p9), %s1933_s9, %s1933_s9 }
 0x12b   : > { %1355 = vmatprep.mubr.msk.bf16.mxu0 %vm330_vm9, %v1560_v13  ;;  %1365 = vmatprep.subr.bf16.mxu1 %v1565_v24  ;;  %v1587_v37 = vld [vmem:[#allocation20 + $0x8] sm:$0xff]   ;;  %v1588_v38 = vld [vmem:[#allocation20 + $0x10] sm:$0xff]   ;;  %v1589_v39 = vld [vmem:[#allocation20 + $0x18] sm:$0xff]  }
 0x12c   : > { %1400 = vmatpush3.bf16.msra.mxu0 %v1578_v30  ;;  %p1940_p13 = por (%p275_p9), %p1939_p12, %p1938_p11 }
 0x12d   : > { %1401 = vmatprep.subr.bf16.mxu0 %v1579_v31 }
 0x12e   : > { %1366 = vmatpush3.bf16.msra.mxu1 %v1565_v24  ;;  %p1941_p0 = pnand (%p275_p9), %p1940_p13, %p1934_p10 }
 0x12f   : > { %1367 = vmatprep.subr.bf16.mxu1 %v1566_v25 }
 0x130   : > { %1402 = vmatpush3.bf16.msra.mxu0 %v1579_v31 }
 0x131   : > { %1403 = vmatprep.subr.bf16.mxu0 %v1580_v32 }
 0x132   : > { %1356 = vmatmul.mubr.msk.bf16.gmra.mrb[4].mxu0 %vm330_vm9, %v1561_v16  ;;  %1368 = vmatpush3.bf16.msra.mxu1 %v1566_v25 }
 0x133   : > { %1369 = vmatprep.subr.bf16.mxu1 %v1567_v26 }
 0x134   : > { %1404 = vmatpush3.bf16.msra.mxu0 %v1580_v32 }
 0x135   : > { %1405 = vmatprep.subr.bf16.mxu0 %v1581_v33 }
 0x136   : > { %1370 = vmatpush3.bf16.msra.mxu1 %v1567_v26 }
 0x137   : > { %1371 = vmatprep.subr.bf16.mxu1 %v1568_v27 }
 0x138   : > { %1406 = vmatpush3.bf16.msra.mxu0 %v1581_v33 }
 0x139   : > { %1407 = vmatprep.subr.bf16.mxu0 %v1582_v34 }
 0x13a   : > { %1372 = vmatpush3.bf16.msra.mxu1 %v1568_v27  ;;  %v2073_v27 = vmov 0.0  }
 0x13b   : > { %1373 = vmatprep.subr.bf16.mxu1 %v1569_v28 }
 0x13c   : > { %1408 = vmatpush3.bf16.msra.mxu0 %v1582_v34 }
 0x13d   : > { %1409 = vmatprep.subr.bf16.mxu0 %v1583_v35 }
 0x13e   : > { %1374 = vmatpush3.bf16.msra.mxu1 %v1569_v28  ;;  %v1261_v28 = vld [vmem:[#allocation19] ss:$0 sm:$0xff] }
 0x13f   : > { %1379 = vmatprep.subr.bf16.mxu1 %v1570_v29 }
 0x140   : > { %1410 = vmatpush3.bf16.msra.mxu0 %v1583_v35 }
 0x141   : > { %1411 = vmatprep.subr.bf16.mxu0 %v1584_v6 }
 0x144   : > { %1412 = vmatpush3.bf16.msra.mxu0 %v1584_v6 }
 0x145   : > { %1413 = vmatprep.subr.bf16.mxu0 %v1585_v8 }
 0x148   : > { %1414 = vmatpush3.bf16.msra.mxu0 %v1585_v8 }
 0x149   : > { %1419 = vmatprep.subr.bf16.mxu0 %v2073_v27 }
 0x186   : > { %v791_v35 = vpop.trf.xlu0 }
 0x1fd   : > { %v1353_v42 = vpop.f32.mrb[0].mxu0 }
 0x1fe   : > { %v377_v45 = vpop.f32.mrb[1].mxu0  ;;  %v410_v47 = vadd.f32 %v1353_v42, %v299_v40  ;;  %v1590_v40 = vld [vmem:[#allocation20 + $0x20] sm:$0xff]   ;;  %v1592_v42 = vld [vmem:[#allocation20 + $0x30] sm:$0xff]  }
 0x1ff   : > { %v1354_v46 = vpop.f32.mrb[2].mxu0  ;;  %v408_v50 = vadd.f32 %v377_v45, %v297_v43  ;;  %v1593_v43 = vld [vmem:[#allocation20 + $0x38] sm:$0xff]   ;;  %v1595_v45 = vld [vmem:[#allocation23 + $0x8] sm:$0xff]  }
 0x200   : > { %v411_v48 = vadd.f32 %v1354_v46, %v300_v41  ;;  %v380_v49 = vpop.f32.mrb[3].mxu0  ;;  %v1591_v41 = vld [vmem:[#allocation20 + $0x28] sm:$0xff]   ;;  %v1596_v46 = vld [vmem:[#allocation23 + $0x10] sm:$0xff]  }
 0x201   : > { %v409_v51 = vadd.f32 %v380_v49, %v298_v44  ;;  %v1594_v44 = vld [vmem:[#allocation23] sm:$0xff]   ;;  %v1599_v49 = vld [vmem:[#allocation23 + $0x28] sm:$0xff]  }
 0x202   : > { %v413_v52 = vpack.c.bf16 %v411_v48, %v410_v47  ;;  %v1597_v47 = vld [vmem:[#allocation23 + $0x18] sm:$0xff]   ;;  %v1598_v48 = vld [vmem:[#allocation23 + $0x20] sm:$0xff]  }
 0x203   : > { %v412_v53 = vpack.c.bf16 %v409_v51, %v408_v50 }
 0x205   : > { %v1357_v54 = vpop.f32.mrb[4].mxu0 }
 0x206   : > { %v393_v55 = vpop.f32.mrb[5].mxu0 }
 0x207   : > { %v1358_v56 = vpop.f32.mrb[6].mxu0 }
 0x208   : > { %v431_v57 = vpack.c.bf16 %v1358_v56, %v1357_v54  ;;  %v396_v58 = vpop.f32.mrb[7].mxu0 }
 0x209   : > { %v430_v59 = vpack.c.bf16 %v396_v58, %v393_v55  ;;  %v1601_v58 = vld [vmem:[#allocation23 + $0x38] sm:$0xff]  }
 0x20b   : > { %1375 = vmatprep.mubr.bf16.mxu1 %v430_v59  ;;  %v1090_v59 = vpack.c.bf16 %v2043_v5, %v2047_v4 }
 0x20c   : > { %1376 = vmatmul.mubr.bf16.vlgmr.msra.gmra.mrb[0].mxu1 %v431_v57  ;;  %v1600_v57 = vld [vmem:[#allocation23 + $0x30] sm:$0xff]  }
 0x20d   : > { %1380 = vmatpush3.bf16.msra.mxu1 %v1570_v29 }
 0x20e   : > { %1381 = vmatprep.subr.bf16.mxu1 %v1571_v60 }
 0x211   : > { %1382 = vmatpush3.bf16.msra.mxu1 %v1571_v60  ;;  %v1602_v60 = vld [vmem:[#allocation11] sm:$0xff]  }
 0x212   : > { %1383 = vmatprep.subr.bf16.mxu1 %v1572_v61 }
 0x215   : > { %1384 = vmatpush3.bf16.msra.mxu1 %v1572_v61 }
 0x216   : > { %1385 = vmatprep.subr.bf16.mxu1 %v1573_v62 }
 0x219   : > { %1386 = vmatpush3.bf16.msra.mxu1 %v1573_v62 }
 0x21a   : > { %1387 = vmatprep.subr.bf16.mxu1 %v1574_v63 }
 0x21d   : > { %1388 = vmatpush3.bf16.msra.mxu1 %v1574_v63 }
 0x21e   : > { %1389 = vmatprep.subr.bf16.mxu1 %v1575_v0 }
 0x221   : > { %1390 = vmatpush3.bf16.msra.mxu1 %v1575_v0 }
 0x222   : > { %1391 = vmatprep.subr.bf16.mxu1 %v1576_v1 }
 0x225   : > { %1392 = vmatpush3.bf16.msra.mxu1 %v1576_v1 }
 0x226   : > { %1393 = vmatprep.subr.bf16.mxu1 %v1577_v2 }
 0x229   : > { %1394 = vmatpush3.bf16.msra.mxu1 %v1577_v2 }
 0x22a   : > { %1447 = vmatprep.subr.bf16.mxu1 %v2073_v27 }
 0x22c   : > { %1396 = vmatmul.mubr.bf16.vlgmr.msra.gmra.mrb[0].mxu1 %v413_v52 }
 0x22d   : > { %1463 = vmatprep.mubr.msk.bf16.mxu1 %vm2074_vm10, %v2073_v27  ;;  %1448 = vmatpush3.bf16.msra.mxu1 %v1594_v44 }
 0x22e   : > { %1449 = vmatprep.subr.bf16.mxu1 %v2073_v27 }
 0x231   : > { %1450 = vmatpush3.bf16.msra.mxu1 %v1595_v45 }
 0x232   : > { %1451 = vmatprep.subr.bf16.mxu1 %v2073_v27 }
 0x235   : > { %1452 = vmatpush3.bf16.msra.mxu1 %v1596_v46 }
 0x236   : > { %1453 = vmatprep.subr.bf16.mxu1 %v2073_v27 }
 0x239   : > { %1454 = vmatpush3.bf16.msra.mxu1 %v1597_v47 }
 0x23a   : > { %1455 = vmatprep.subr.bf16.mxu1 %v2073_v27 }
 0x23d   : > { %1456 = vmatpush3.bf16.msra.mxu1 %v1598_v48 }
 0x23e   : > { %1457 = vmatprep.subr.bf16.mxu1 %v2073_v27 }
 0x241   : > { %1458 = vmatpush3.bf16.msra.mxu1 %v1599_v49 }
 0x242   : > { %1459 = vmatprep.subr.bf16.mxu1 %v2073_v27 }
 0x245   : > { %1460 = vmatpush3.bf16.msra.mxu1 %v1600_v57 }
 0x246   : > { %1461 = vmatprep.subr.bf16.mxu1 %v2073_v27 }
 0x249   : > { %1462 = vmatpush3.bf16.msra.mxu1 %v1601_v58 }
 0x2ff   : > { %v1397_v10 = vpop.f32.mrb[0].mxu1 }
 0x300   : > { %v651_v12 = vadd.f32 %v1397_v10, %v1260_v9  ;;  %v627_v13 = vpop.f32.mrb[1].mxu1 }
 0x301   : > { %v649_v14 = vadd.f32 %v1260_v9, %v627_v13  ;;  %v1398_v15 = vpop.f32.mrb[2].mxu1 }
 0x302   : > { %v652_v16 = vadd.f32 %v1398_v15, %v1260_v9  ;;  %v630_v19 = vpop.f32.mrb[3].mxu1  ;;  %v655_v21 = vmax.f32 %v651_v12, 0.0 }
 0x303   : > { %v650_v20 = vadd.f32 %v1260_v9, %v630_v19  ;;  %v653_v23 = vmax.f32 %v649_v14, 0.0 }
 0x304   : > { %v656_v22 = vmax.f32 %v652_v16, 0.0 }
 0x305   : > { %v654_v24 = vmax.f32 %v650_v20, 0.0  ;;  %v1280_v20 = vld [vmem:[#allocation25] ss:$0 sm:$0xff] }
 0x306   : > { %v658_v25 = vpack.c.bf16 %v656_v22, %v655_v21 }
 0x307   : > { %v657_v26 = vpack.c.bf16 %v654_v24, %v653_v23  ;;  %v1079_v24 = vstv %s1078_s29 }
 0x309   : > { %1415 = vmatprep.mubr.bf16.mxu0 %v657_v26 }
 0x30a   : > { %1416 = vmatmul.mubr.bf16.vlgmr.msra.gmra.mrb[8].mxu0 %v658_v25  ;;  %v1083_v25 = vstv %s1082_s30 }
 0x30b   : > { %1395 = vmatprep.mubr.bf16.mxu0 %v412_v53 }
 0x30c   : > { %1423 = vmatprep.mubr.msk.bf16.mxu0 %vm2074_vm10, %v2073_v27 }
 0x3dd   : > { %v1417_v29 = vpop.f32.mrb[8].mxu0 }
 0x3de   : > { %v2479_v9 = vadd.f32 %v1417_v29, %v1261_v28   ;;  %v764_v30 = vpop.f32.mrb[9].mxu0 }
 0x3df   : > { %v2481_v6 = vadd.f32 %v1261_v28, %v764_v30   ;;  %v1418_v31 = vpop.f32.mrb[10].mxu0 }
 0x3e0   : > { %1158 = vst [vmem:[%s1155_s2 + $0x10] sm:$0xff] %v2479_v9  ;;  %v2486_v10 = vadd.f32 %v1418_v31, %v1261_v28   ;;  %v767_v32 = vpop.f32.mrb[11].mxu0 }
 0x3e1   : > { %1156 = vst [vmem:[%s1155_s2] sm:$0xff] %v2481_v6  ;;  %v2489_v8 = vadd.f32 %v1261_v28, %v767_v32  }
 0x3e2   : > { %v780_v33 = vpack.c.bf16 %v2486_v10, %v2479_v9  ;;  %1159 = vst [vmem:[%s1155_s2 + $0x18] sm:$0xff] %v2486_v10 }
 0x3e3   : > { %v779_v34 = vpack.c.bf16 %v2489_v8, %v2481_v6  ;;  %1157 = vst [vmem:[%s1155_s2 + $0x8] sm:$0xff] %v2489_v8 }
 0x3e5   : > { %1420 = vmatpush3.bf16.msra.mxu0 %v779_v34 }
 0x3e6   : > { %1421 = vmatprep.subr.bf16.mxu0 %v2073_v27 }
 0x3e9   : > { %1422 = vmatpush3.bf16.msra.mxu0 %v780_v33 }
 0x3ea   : > { %1427 = vmatprep.subr.bf16.mxu0 %v2073_v27 }
 0x3ec   : > { %1424 = vmatmul.mubr.msk.bf16.vlgmr.msra.gmra.mrb[12].mxu0 %vm799_vm11, %v791_v35 }
 0x3ed   : > { %1428 = vmatpush3.bf16.msra.mxu0 %v1586_v36  ;;  %1443 = vmatprep.mubr.msk.bf16.mxu0 %vm2074_vm10, %v2073_v27 }
 0x3ee   : > { %1429 = vmatprep.subr.bf16.mxu0 %v2073_v27 }
 0x3f1   : > { %1430 = vmatpush3.bf16.msra.mxu0 %v1587_v37 }
 0x3f2   : > { %1431 = vmatprep.subr.bf16.mxu0 %v2073_v27 }
 0x3f5   : > { %1432 = vmatpush3.bf16.msra.mxu0 %v1588_v38 }
 0x3f6   : > { %1433 = vmatprep.subr.bf16.mxu0 %v2073_v27 }
 0x3f9   : > { %1434 = vmatpush3.bf16.msra.mxu0 %v1589_v39 }
 0x3fa   : > { %1435 = vmatprep.subr.bf16.mxu0 %v2073_v27 }
 0x3fd   : > { %1436 = vmatpush3.bf16.msra.mxu0 %v1590_v40 }
 0x3fe   : > { %1437 = vmatprep.subr.bf16.mxu0 %v2073_v27 }
 0x401   : > { %1438 = vmatpush3.bf16.msra.mxu0 %v1591_v41 }
 0x402   : > { %1439 = vmatprep.subr.bf16.mxu0 %v2073_v27 }
 0x405   : > { %1440 = vmatpush3.bf16.msra.mxu0 %v1592_v42 }
 0x406   : > { %1441 = vmatprep.subr.bf16.mxu0 %v2073_v27 }
 0x409   : > { %1442 = vmatpush3.bf16.msra.mxu0 %v1593_v43 }
 0x40a   : > { %1467 = vmatprep.subr.bf16.mxu0 %v2073_v27 }
 0x4bf   : > { %v837_v50 = vpop.f32.mrb[12].mxu0 }
 0x4c0   : > { %v1425_v51 = vpop.f32.mrb[13].mxu0  ;;  %v844_v53 = vadd.f32 %v837_v50, %v2456_v17  ;;  %v1271_v17 = vld [vmem:[#allocation22] ss:$0 sm:$0xff] }
 0x4c1   : > { %v840_v52 = vpop.f32.mrb[14].mxu0 }
 0x4c2   : > { %v845_v54 = vadd.f32 %v840_v52, %v2459_v18  ;;  %v1426_v55 = vpop.f32.mrb[15].mxu0 }
 0x4c4   : > { %v846_v56 = vpack.c.bf16 %v845_v54, %v844_v53 }
 0x4c6   : > { %1444 = vmatmul.mubr.bf16.vlgmr.msra.gmra.mrb[16].mxu0 %v846_v56 }
 0x4c7   : > { %1469 = vmatprep.mubr.msk.bf16.mxu0 %vm2074_vm10, %v2073_v27  ;;  %1468 = vmatpush3.bf16.msra.mxu0 %v1090_v59 }
 0x4ce   : > { %1470 = vmatmul.mubr.msk.bf16.vlgmr.msra.gmra.mrb[20].mxu0 %vm330_vm9, %v1602_v60 }
 0x599   : > { %v952_v18 = vpop.f32.mrb[16].mxu0 }
 0x59a   : > { %v953_v61 = vadd.f32 %v1271_v17, %v952_v18  ;;  %v1445_v62 = vpop.f32.mrb[17].mxu0 }
 0x59b   : > { %v955_v63 = vpop.f32.mrb[18].mxu0 }
 0x59c   : > { %v956_v0 = vadd.f32 %v1271_v17, %v955_v63  ;;  %v1446_v1 = vpop.f32.mrb[19].mxu0  ;;  %v959_v2 = vmax.f32 %v953_v61, 0.0 }
 0x59e   : > { %v960_v12 = vmax.f32 %v956_v0, 0.0 }
 0x5a0   : > { %v961_v13 = vpack.c.bf16 %v960_v12, %v959_v2 }
 0x5a1   : > { %v1133_v14 = vpop.f32.mrb[20].mxu0 }
 0x5a2   : > { %1464 = vmatmul.mubr.bf16.vlgmr.msra.gmra.mrb[4].mxu1 %v961_v13  ;;  %v1471_v15 = vpop.f32.mrb[21].mxu0  ;;  %v1140_v33 = vmul.f32 -0.1, %v1133_v14 }
 0x5a3   : > { %v1136_v16 = vpop.f32.mrb[22].mxu0 }
 0x5a4   : > { %v1472_v19 = vpop.f32.mrb[23].mxu0  ;;  %v1141_v37 = vmul.f32 -0.1, %v1136_v16  ;;  %v1148_v41 = vmul.f32 %v2414_v11, %v1140_v33 }
 0x5a6   : > { %v1149_v45 = vmul.f32 %v2414_v11, %v1141_v37 }
 0x675   : > { %v1067_v21 = vpop.f32.mrb[4].mxu1 }
 0x676   : > { %v1068_v22 = vadd.f32 %v1280_v20, %v1067_v21   ;;  %v1465_v23 = vpop.f32.mrb[5].mxu1 }
 0x677   : > { %v1070_v26 = vpop.f32.mrb[6].mxu1 }
 0x678   : > { %v1074_v27 = vsub.f32 %v1068_v22, %v2047_v4  ;;  %v1071_v28 = vadd.f32 %v1280_v20, %v1070_v26   ;;  %v1466_v29 = vpop.f32.mrb[7].mxu1  ;;  %v1142_v38 = vmul.f32 %v2410_v3, %v1068_v22 }
 0x67a   : > { %v1080_v30 = vmul.f32 %v1079_v24, %v1074_v27  ;;  %v1084_v31 = vmul.f32 %v1083_v25, %v1074_v27  ;;  %v1075_v32 = vsub.f32 %v1071_v28, %v2043_v5  ;;  %v1143_v42 = vmul.f32 %v2410_v3, %v1071_v28 }
 0x67c   : > { %v1086_v34 = vadd.f32 %v1084_v31, %v1080_v30  ;;  %v1081_v35 = vmul.f32 %v1079_v24, %v1075_v32  ;;  %v1085_v36 = vmul.f32 %v1083_v25, %v1075_v32 }
 0x67e   : > { %v1144_v39 = vmul.f32 %v2412_v7, %v1086_v34  ;;  %v1087_v40 = vadd.f32 %v1085_v36, %v1081_v35 }
 0x680   : > { %v1146_v4 = vadd.f32 %v1144_v39, %v1142_v38  ;;  %v1145_v43 = vmul.f32 %v2412_v7, %v1087_v40  ;;  %277 = sbr.rel (!%p275_p9) target bundleno = 287 (0x11f), region = 159 }
 0x682   : > { %v1147_v44 = vadd.f32 %v1145_v43, %v1143_v42  ;;  %v1150_v5 = vadd.f32 %v1148_v41, %v1146_v4  ;;  %v2611_v4 = vmov %v1068_v22 }
 0x684   : > { %1153 = vst [vmem:[%s1152_s5] sm:$0xff] %v1150_v5  ;;  %v1151_v46 = vadd.f32 %v1149_v45, %v1147_v44  ;;  %v2610_v5 = vmov %v1071_v28 }
 0x686   : > { %1154 = vst [vmem:[%s1152_s5 + $0x8] sm:$0xff] %v1151_v46 }
 0x687   :  { %1944 = shalt.err (!%p1941_p0)
}
 0x688   :  { %s1945_s3 = scalar_lea.hbm %s2605_s15, 1024 }
 0x689   :  { %p1946_p1 = scmp.ne.s32.totalorder %s2605_s15, %s1945_s3  ;;  %p1949_p2 = scmp.lt.u32.totalorder %s1945_s3, %s2605_s15 }
 0x68b   :  { %p1951_p3 = pnand %p1949_p2, %p1946_p1 }
 0x68d   :  { %1954 = shalt.err (!%p1951_p3)
}
 0x68e   :  { %1171 = dma.vmem_to_hbm [thread:$0]  %s1166_s24, 1024, %s2605_s15, [#allocation4], %s2055_s18, %s2055_s18, %s2056_s19  }
 0x68f   :  { %s1955_s12 = scalar_lea.vmem %s2553_s1, 2048  ;;  %p1960_p5 = scmp.lt.s32.totalorder %s2553_s1, %s2553_s1 }
 0x690   :  { %p1956_p4 = scmp.ne.s32.totalorder %s2553_s1, %s1955_s12  ;;  %p1961_p6 = scmp.lt.s32.totalorder %s1955_s12, %s1955_s12 }
 0x692   :  { %p1962_p7 = por %p1961_p6, %p1960_p5 }
 0x694   :  { %p1963_p8 = pnand %p1962_p7, %p1956_p4 }
 0x696   :  { %1966 = shalt.err (!%p1963_p8)
}
 0x697   :  { %s1967_s14 = scalar_lea.hbm %s2606_s16, 2048 }
 0x698   :  { %p1968_p9 = scmp.ne.s32.totalorder %s2606_s16, %s1967_s14  ;;  %p1971_p10 = scmp.lt.u32.totalorder %s1967_s14, %s2606_s16 }
 0x69a   :  { %p1973_p11 = pnand %p1971_p10, %p1968_p9 }
 0x69c   :  { %1976 = shalt.err (!%p1973_p11)
}
 0x69d   :  { %1183 = dma.vmem_to_hbm [thread:$0]  %s2553_s1, 2048, %s2606_s16, [#allocation28], %s2055_s18, %s2055_s18, %s2056_s19  }
 0x69e   :  { %2021 = dma.done.wait [#allocation4], 1024  }
 0x69f   :  { %2022 = vsyncadd [#allocation4], 4294966272 }
 0x6a0   :  { %2023 = dma.done.wait [#allocation28], 2048  }
 0x6a1   :  { %2024 = vsyncadd [#allocation28], 4294965248 }
 0x6a2   :  { %1190 = vsyncpa [#allocation3], 1 }
 0x6a3   :  { %1191 = vsyncpa [#allocation6], 1 }
 0x6a4   :  { %1192 = vsyncpa [#allocation9], 1 }
 0x6a5   :  { %1193 = vsyncpa [#allocation12], 1 }
 0x6a6   :  { %1194 = vsyncpa [#allocation15], 1 }
 0x6a7   :  { %1195 = vsyncpa [#allocation18], 1 }
 0x6a8   :  { %1196 = vsyncpa [#allocation21], 1 }
 0x6a9   :  { %1197 = vsyncpa [#allocation24], 1 }
 0x6aa   :  { %1198 = vsyncpa [#allocation4], 1 }
 0x6ab   :  { %1199 = vsyncpa [#allocation28], 1 }

</bundles_post_ra>
